<compile_context>
chip_gen: v7x
topology: tpu7x:2x2x1
jax: 0.10.0
libtpu: 0.0.40
codegen_flags: <defaults>
</compile_context>

<pallas_src>
import math
import numpy as np
import jax
import jax.numpy as jnp
from jax.experimental import pallas as pl
from jax.experimental.pallas import tpu as pltpu

SAMPLE_RATE = 16000
N_HARMONICS = 101


def _round_up(x, m):
    return ((x + m - 1) // m) * m


def _is_narrow_mxu_chip():
    """True on chips with a 128-wide MXU and no bf16 VPU/EUP (v2..v5e)."""
    try:
        kind = jax.devices()[0].device_kind.lower()
        return any(v in kind for v in ("v2", "v3", "v4", "v5"))
    except Exception:
        return False


# ----------------------------------------------------------------------------
# Plain-JAX glue: DDSP-style harmonic synth + STFT magnitude
# ----------------------------------------------------------------------------
def exp_sigmoid(x, exponent=10.0, max_value=2.0, threshold=1e-7):
    return max_value * jax.nn.sigmoid(x) ** jnp.log(exponent) + threshold


def harmonic_synth(amplitudes, harmonic_distribution, f0_hz, n_samples):
    """DDSP Harmonic synth (exp_sigmoid scaling, sr=16kHz, linear upsampling)."""
    amplitudes = exp_sigmoid(amplitudes)                         # (B, T, 1)
    harmonic_distribution = exp_sigmoid(harmonic_distribution)   # (B, T, H)
    harm_numbers = jnp.arange(1, N_HARMONICS + 1, dtype=jnp.float32)
    harm_freqs = f0_hz * harm_numbers[None, None, :]             # (B, T, H)
    # zero harmonics above Nyquist, then renormalize the distribution
    mask = (harm_freqs < SAMPLE_RATE / 2.0).astype(jnp.float32)
    harmonic_distribution = harmonic_distribution * mask
    harmonic_distribution = harmonic_distribution / (
        jnp.sum(harmonic_distribution, axis=-1, keepdims=True) + 1e-8)
    harm_amps = amplitudes * harmonic_distribution               # (B, T, H)

    def upsample(x):  # linear-interp frames -> samples along axis 1
        _, T, _ = x.shape
        t_out = jnp.linspace(0.0, T - 1.0, n_samples)
        lo = jnp.floor(t_out).astype(jnp.int32)
        hi = jnp.minimum(lo + 1, T - 1)
        w = (t_out - lo.astype(jnp.float32))[None, :, None]
        return x[:, lo, :] * (1.0 - w) + x[:, hi, :] * w

    freqs_up = upsample(harm_freqs)                              # (B, N, H)
    amps_up = upsample(harm_amps)                                # (B, N, H)
    omegas = 2.0 * jnp.pi * jnp.cumsum(freqs_up / SAMPLE_RATE, axis=1)
    return jnp.sum(amps_up * jnp.sin(omegas), axis=-1)           # (B, N)


def compute_mag(audio, n_fft, overlap):
    """STFT magnitude, center=True + pad_end=True, Hann (periodic) window.
    Returns frames-major (B, n_frames, n_fft//2 + 1) -- i.e. the PyTorch
    compute_mag(...) result already transposed(1,2), so no redundant
    transpose pair is needed downstream."""
    # TODO(synk): hop = int(n_fft * (1 - overlap)) truncates (254*0.25 -> 63);
    #             matches the previous implementation's convention.
    hop = int(n_fft * (1.0 - overlap))
    pad = n_fft // 2
    audio = jnp.pad(audio, ((0, 0), (pad, pad)), mode="reflect")   # center=True
    length = audio.shape[-1]
    n_frames = int(math.ceil(max(length - n_fft, 0) / hop)) + 1
    pad_end = (n_frames - 1) * hop + n_fft - length                # pad_end=True
    audio = jnp.pad(audio, ((0, 0), (0, pad_end)))
    idx = np.arange(n_fft)[None, :] + hop * np.arange(n_frames)[:, None]
    frames = audio[:, idx]                                         # (B, T, n_fft)
    n = np.arange(n_fft)
    window = jnp.asarray(0.5 - 0.5 * np.cos(2.0 * np.pi * n / n_fft),
                         dtype=jnp.float32)
    spec = jnp.fft.rfft(frames * window, axis=-1)
    return jnp.abs(spec).astype(jnp.float32)                       # (B, T, F)


# ----------------------------------------------------------------------------
# Pallas kernels: FiLM MLP
#   h      = tanh(x @ [Wg1 | Wb1] + [bg1 | bb1])     one (tm,F)x(F,2F) matmul
#   gamma  = relu(h[:, :F] @ Wg2 + bg2)
#   beta   = relu(h[:, F:] @ Wb2 + bb2)
#
# NOTE: the last grid block may contain stale VMEM rows beyond `rows`
# (possibly Inf/NaN).  That is safe because every op below is row-independent
# (all contractions are over the feature axis) and Pallas masks out-of-bounds
# writes.  Do NOT add any cross-row op (row reduction / norm) to these kernels.
# ----------------------------------------------------------------------------
def film_kernel_wide(x_ref, w1_ref, b1_ref, w2_ref, b2_ref,
                     gamma_ref, beta_ref):
    """v6e / v7x path: 256-wide block-diagonal layer 2, bf16 tanh."""
    F = gamma_ref.shape[1]
    x = x_ref[...]                                               # (tm, F) bf16
    h = jnp.dot(x, w1_ref[...], preferred_element_type=jnp.float32)
    # bf16 tanh: EUP supports bf16 on v6e/v7x (2x packed vregs) and layer 2
    # consumes bf16 operands anyway.
    h = jnp.tanh((h + b1_ref[...]).astype(jnp.bfloat16))         # (tm, 2F) bf16
    # single 256-wide block-diagonal layer 2 (fills the 2x256x256 MXU)
    y = jnp.dot(h, w2_ref[...], preferred_element_type=jnp.float32) + b2_ref[...]
    y = jnp.maximum(y, 0.0)
    gamma_ref[...] = y[:, :F].astype(gamma_ref.dtype)            # lane-128 aligned
    beta_ref[...] = y[:, F:].astype(beta_ref.dtype)


def film_kernel_narrow(x_ref, w1_ref, b1_ref, wg2_ref, bg2_ref, wb2_ref, bb2_ref,
                       gamma_ref, beta_ref):
    """v5e (and older) path: f32 tanh, two 128-wide layer-2 dots."""
    F = x_ref.shape[1]
    x = x_ref[...]                                               # (tm, F) bf16
    h = jnp.dot(x, w1_ref[...], preferred_element_type=jnp.float32)
    h = jnp.tanh(h + b1_ref[...])                                # (tm, 2F) f32
    hg = h[:, :F].astype(wg2_ref.dtype)                          # bf16 operands
    hb = h[:, F:].astype(wb2_ref.dtype)

    g = jnp.dot(hg, wg2_ref[...], preferred_element_type=jnp.float32) + bg2_ref[...]
    gamma_ref[...] = jnp.maximum(g, 0.0).astype(gamma_ref.dtype)

    b = jnp.dot(hb, wb2_ref[...], preferred_element_type=jnp.float32) + bb2_ref[...]
    beta_ref[...] = jnp.maximum(b, 0.0).astype(beta_ref.dtype)


def film_mlp(x_rows, p, wide, tm=2048):
    """x_rows: (rows, F) bf16.  Returns gamma, beta as (rows, F) bf16."""
    rows, F = x_rows.shape
    if rows < 2 * tm:
        # Even two-way split (16-row aligned for bf16 sublane packing) so both
        # v7x TensorCores get ~equal work on small inputs; harmless elsewhere.
        tm = max(16, _round_up(pl.cdiv(rows, 2), 16))
    grid = (pl.cdiv(rows, tm),)          # Pallas masks the partial tail block

    x_spec = pl.BlockSpec((tm, F), lambda i: (i, 0))
    out_spec = pl.BlockSpec((tm, F), lambda i: (i, 0))
    out_shape = (jax.ShapeDtypeStruct((rows, F), jnp.bfloat16),
                 jax.ShapeDtypeStruct((rows, F), jnp.bfloat16))

    if wide:
        kernel = film_kernel_wide
        operands = (x_rows, p["w1"], p["b1"], p["w2"], p["b2"])
        in_specs = [x_spec,
                    pl.BlockSpec((F, 2 * F), lambda i: (0, 0)),
                    pl.BlockSpec((1, 2 * F), lambda i: (0, 0)),
                    pl.BlockSpec((2 * F, 2 * F), lambda i: (0, 0)),
                    pl.BlockSpec((1, 2 * F), lambda i: (0, 0))]
    else:
        kernel = film_kernel_narrow
        operands = (x_rows, p["w1"], p["b1"], p["wg2"], p["bg2"],
                    p["wb2"], p["bb2"])
        in_specs = [x_spec,
                    pl.BlockSpec((F, 2 * F), lambda i: (0, 0)),
                    pl.BlockSpec((1, 2 * F), lambda i: (0, 0)),
                    pl.BlockSpec((F, F), lambda i: (0, 0)),
                    pl.BlockSpec((1, F), lambda i: (0, 0)),
                    pl.BlockSpec((F, F), lambda i: (0, 0)),
                    pl.BlockSpec((1, F), lambda i: (0, 0))]

    weight_bytes = sum(int(np.prod(w.shape)) * w.dtype.itemsize
                       for w in operands[1:])
    cost = pl.CostEstimate(
        flops=rows * 8 * F * F,           # 2 layers x 2 MLPs x F x F MACs x 2
        transcendentals=rows * 2 * F,     # tanh over (rows, 2F)
        bytes_accessed=rows * F * 2 + 2 * rows * F * 2 + weight_bytes)

    gamma, beta = pl.pallas_call(
        kernel,
        out_shape=out_shape,
        grid=grid,
        in_specs=in_specs,
        out_specs=(out_spec, out_spec),
        compiler_params=pltpu.CompilerParams(
            dimension_semantics=("parallel",)),
        cost_estimate=cost,
    )(*operands)
    return gamma, beta


# ----------------------------------------------------------------------------
# ConditionGenerator
# ----------------------------------------------------------------------------
class ConditionGenerator:
    def __init__(self, n_fft, overlap, key, n_samples=2048):
        # TODO(synk): original module hardcodes Harmonic(n_samples=64000);
        #             reduced here for a small self-contained demo.
        self.n_fft = n_fft
        self.overlap = overlap
        self.n_samples = n_samples
        self.wide = not _is_narrow_mxu_chip()     # 256-wide MXU / bf16 EUP path
        F = n_fft // 2 + 1
        self.in_features = F
        bound = 1.0 / math.sqrt(F)
        keys = jax.random.split(key, 8)

        def linear(kw, kb):
            # PyTorch Linear: weight (out,in), y = x @ W.T + b.
            w = jax.random.uniform(kw, (F, F), jnp.float32, -bound, bound)
            b = jax.random.uniform(kb, (1, F), jnp.float32, -bound, bound)
            return w.T, b  # stored pre-transposed so kernels/ref do x @ W.T

        wg1, bg1 = linear(keys[0], keys[1])
        wg2, bg2 = linear(keys[2], keys[3])
        wb1, bb1 = linear(keys[4], keys[5])
        wb2, bb2 = linear(keys[6], keys[7])

        # fp32 originals (reference / tolerance testing)
        self.params_f32 = dict(wg1=wg1, bg1=bg1, wg2=wg2, bg2=bg2,
                               wb1=wb1, bb1=bb1, wb2=wb2, bb2=bb2)
        # kernel-ready params: fused first layer, bf16 matmul operands,
        # biases stay f32.
        self.kernel_params = dict(
            w1=jnp.concatenate([wg1, wb1], axis=1).astype(jnp.bfloat16),  # (F,2F)
            b1=jnp.concatenate([bg1, bb1], axis=1),                       # (1,2F) f32
            wg2=wg2.astype(jnp.bfloat16), bg2=bg2,
            wb2=wb2.astype(jnp.bfloat16), bb2=bb2)
        if self.wide:
            z = jnp.zeros((F, F), jnp.float32)
            # block-diagonal 256-wide layer 2 (off-diagonal zeros ride idle lanes)
            self.kernel_params["w2"] = jnp.concatenate(
                [jnp.concatenate([wg2, z], axis=1),
                 jnp.concatenate([z, wb2], axis=1)], axis=0).astype(jnp.bfloat16)
            self.kernel_params["b2"] = jnp.concatenate([bg2, bb2], axis=1)

    def _features(self, f0_hz):
        B, n_frames, _ = f0_hz.shape
        harmonic_amplitudes = jnp.ones((B, n_frames, 1), jnp.float32)
        harmonic_distribution = jnp.ones((B, n_frames, N_HARMONICS), jnp.float32)
        harmonic_signal = harmonic_synth(harmonic_amplitudes,
                                         harmonic_distribution,
                                         f0_hz, self.n_samples)
        # frames-major (B, T, F): no transpose/un-transpose round trip
        return compute_mag(harmonic_signal, self.n_fft, self.overlap)

    def __call__(self, f0_hz):
        harmonic_mag = self._features(f0_hz)                     # (B, T, F) f32
        Bm, T, F = harmonic_mag.shape
        # bf16 matmul operand; the cast fuses into the producer fusion.
        x_rows = harmonic_mag.reshape(Bm * T, F).astype(jnp.bfloat16)
        gamma_rows, beta_rows = film_mlp(x_rows, self.kernel_params, self.wide)
        # final transpose stays in XLA (lane-dense F=128 kernel output);
        # bf16 outputs halve its traffic.
        gamma = jnp.transpose(gamma_rows.reshape(Bm, T, F), (0, 2, 1))  # (B,F,T)
        beta = jnp.transpose(beta_rows.reshape(Bm, T, F), (0, 2, 1))    # (B,F,T)
        return beta, gamma

    def reference(self, f0_hz):
        """Pure-JAX float32 reference of the same forward pass."""
        mag = self._features(f0_hz)                              # (B, T, F)
        p = self.params_f32
        g = jnp.tanh(mag @ p["wg1"] + p["bg1"])
        g = jnp.maximum(g @ p["wg2"] + p["bg2"], 0.0)
        b = jnp.tanh(mag @ p["wb1"] + p["bb1"])
        b = jnp.maximum(b @ p["wb2"] + p["bb2"], 0.0)
        return jnp.transpose(b, (0, 2, 1)), jnp.transpose(g, (0, 2, 1))


if __name__ == "__main__":
    key = jax.random.PRNGKey(0)
    k_f0, k_params = jax.random.split(key)

    n_fft = 254          # -> in_features = 128 (lane-aligned)
    overlap = 0.75
    batch, n_frames = 2, 8
    f0_hz = 220.0 + 20.0 * jax.random.uniform(k_f0, (batch, n_frames, 1),
                                              jnp.float32)

    model = ConditionGenerator(n_fft, overlap, k_params)
    fwd = jax.jit(model.__call__)
    beta, gamma = fwd(f0_hz)
    jax.block_until_ready((beta, gamma))

    # shape / semantics checks
    assert beta.shape == gamma.shape
    assert beta.shape[0] == batch and beta.shape[1] == n_fft // 2 + 1
    assert bool(jnp.all(beta >= 0.0)) and bool(jnp.all(gamma >= 0.0))

    # fp32 plain-JAX reference (bf16 operands/outputs -> loose tolerance)
    beta_r, gamma_r = model.reference(f0_hz)
    beta_f32 = np.asarray(beta.astype(jnp.float32))
    gamma_f32 = np.asarray(gamma.astype(jnp.float32))
    assert np.allclose(beta_f32, np.asarray(beta_r), rtol=5e-2, atol=5e-2)
    assert np.allclose(gamma_f32, np.asarray(gamma_r), rtol=5e-2, atol=5e-2)

    print("KERNEL_OK")
</pallas_src>

<mosaic_0001>
module attributes {stable_mosaic.version = 11 : i64} {
  func.func @film_kernel_wide(%arg0: i32, %arg1: memref<48x128xbf16, #tpu.memory_space<vmem>>, %arg2: memref<128x256xbf16, #tpu.memory_space<vmem>>, %arg3: memref<1x256xf32, #tpu.memory_space<vmem>>, %arg4: memref<256x256xbf16, #tpu.memory_space<vmem>>, %arg5: memref<1x256xf32, #tpu.memory_space<vmem>>, %arg6: memref<48x128xbf16, #tpu.memory_space<vmem>>, %arg7: memref<48x128xbf16, #tpu.memory_space<vmem>>) attributes {dimension_semantics = [#tpu.dimension_semantics<parallel>], iteration_bounds = array<i64: 2>, scalar_prefetch = 0 : i64, scratch_operands = 0 : i64, tpu.core_type = #tpu.core_type<tc>, window_params = [{transform_indices = @transform_0, window_bounds = array<i64: 48, 128>}, {pipeline_mode = #tpu.pipeline_mode<synchronous>, transform_indices = @transform_1, window_bounds = array<i64: 128, 256>}, {pipeline_mode = #tpu.pipeline_mode<synchronous>, transform_indices = @transform_2, window_bounds = array<i64: 1, 256>}, {pipeline_mode = #tpu.pipeline_mode<synchronous>, transform_indices = @transform_3, window_bounds = array<i64: 256, 256>}, {pipeline_mode = #tpu.pipeline_mode<synchronous>, transform_indices = @transform_4, window_bounds = array<i64: 1, 256>}, {transform_indices = @transform_5, window_bounds = array<i64: 48, 128>}, {transform_indices = @transform_6, window_bounds = array<i64: 48, 128>}]} {
    %c0 = arith.constant 0 : index
    %c0_0 = arith.constant 0 : index
    %0 = vector.load %arg1[%c0, %c0_0] : memref<48x128xbf16, #tpu.memory_space<vmem>>, vector<48x128xbf16>
    %c0_1 = arith.constant 0 : index
    %c0_2 = arith.constant 0 : index
    %1 = vector.load %arg2[%c0_1, %c0_2] : memref<128x256xbf16, #tpu.memory_space<vmem>>, vector<128x256xbf16>
    %cst = arith.constant dense<0.000000e+00> : vector<48x256xf32>
    %2 = tpu.matmul %0, %1, %cst {dimension_numbers = #tpu.dot_dimension_numbers<[1], [0], [0], [1], [0, 0, 1, 1], [], []>} : vector<48x128xbf16>, vector<128x256xbf16>, vector<48x256xf32> -> vector<48x256xf32>
    %c0_3 = arith.constant 0 : index
    %c0_4 = arith.constant 0 : index
    %3 = vector.load %arg3[%c0_3, %c0_4] : memref<1x256xf32, #tpu.memory_space<vmem>>, vector<1x256xf32>
    %4 = vector.broadcast %3 : vector<1x256xf32> to vector<48x256xf32>
    %5 = arith.addf %2, %4 : vector<48x256xf32>
    %6 = arith.truncf %5 : vector<48x256xf32> to vector<48x256xbf16>
    %7 = math.tanh %6 : vector<48x256xbf16>
    %c0_5 = arith.constant 0 : index
    %c0_6 = arith.constant 0 : index
    %8 = vector.load %arg4[%c0_5, %c0_6] : memref<256x256xbf16, #tpu.memory_space<vmem>>, vector<256x256xbf16>
    %cst_7 = arith.constant dense<0.000000e+00> : vector<48x256xf32>
    %9 = tpu.matmul %7, %8, %cst_7 {dimension_numbers = #tpu.dot_dimension_numbers<[1], [0], [0], [1], [0, 0, 1, 1], [], []>} : vector<48x256xbf16>, vector<256x256xbf16>, vector<48x256xf32> -> vector<48x256xf32>
    %c0_8 = arith.constant 0 : index
    %c0_9 = arith.constant 0 : index
    %10 = vector.load %arg5[%c0_8, %c0_9] : memref<1x256xf32, #tpu.memory_space<vmem>>, vector<1x256xf32>
    %11 = vector.broadcast %10 : vector<1x256xf32> to vector<48x256xf32>
    %12 = arith.addf %9, %11 : vector<48x256xf32>
    %cst_10 = arith.constant 0.000000e+00 : f32
    %13 = vector.broadcast %cst_10 : f32 to vector<48x256xf32>
    %14 = arith.maximumf %12, %13 : vector<48x256xf32>
    %15 = vector.extract_strided_slice %14 {offsets = [0, 0], sizes = [48, 128], strides = [1, 1]} : vector<48x256xf32> to vector<48x128xf32>
    %16 = arith.truncf %15 : vector<48x128xf32> to vector<48x128xbf16>
    %c0_11 = arith.constant 0 : index
    %c0_12 = arith.constant 0 : index
    %17 = vector.load %arg6[%c0_11, %c0_12] : memref<48x128xbf16, #tpu.memory_space<vmem>>, vector<48x128xbf16>
    tpu.vector_store %arg6[%c0_11, %c0_12], %16 {strides = array<i32>} : memref<48x128xbf16, #tpu.memory_space<vmem>>, vector<48x128xbf16>,
    %18 = vector.extract_strided_slice %14 {offsets = [0, 128], sizes = [48, 128], strides = [1, 1]} : vector<48x256xf32> to vector<48x128xf32>
    %19 = arith.truncf %18 : vector<48x128xf32> to vector<48x128xbf16>
    %c0_13 = arith.constant 0 : index
    %c0_14 = arith.constant 0 : index
    %20 = vector.load %arg7[%c0_13, %c0_14] : memref<48x128xbf16, #tpu.memory_space<vmem>>, vector<48x128xbf16>
    tpu.vector_store %arg7[%c0_13, %c0_14], %19 {strides = array<i32>} : memref<48x128xbf16, #tpu.memory_space<vmem>>, vector<48x128xbf16>,
    return
  }
  func.func @transform_0(%arg0: i32) -> (i32, i32) {
    %c0_i32 = arith.constant 0 : i32
    %c0_i32_0 = arith.constant 0 : i32
    return %arg0, %c0_i32 : i32, i32
  }
  func.func @transform_1(%arg0: i32) -> (i32, i32) {
    %c0_i32 = arith.constant 0 : i32
    %c0_i32_0 = arith.constant 0 : i32
    %c0_i32_1 = arith.constant 0 : i32
    return %c0_i32, %c0_i32_0 : i32, i32
  }
  func.func @transform_2(%arg0: i32) -> (i32, i32) {
    %c0_i32 = arith.constant 0 : i32
    %c0_i32_0 = arith.constant 0 : i32
    %c0_i32_1 = arith.constant 0 : i32
    return %c0_i32, %c0_i32_0 : i32, i32
  }
  func.func @transform_3(%arg0: i32) -> (i32, i32) {
    %c0_i32 = arith.constant 0 : i32
    %c0_i32_0 = arith.constant 0 : i32
    %c0_i32_1 = arith.constant 0 : i32
    return %c0_i32, %c0_i32_0 : i32, i32
  }
  func.func @transform_4(%arg0: i32) -> (i32, i32) {
    %c0_i32 = arith.constant 0 : i32
    %c0_i32_0 = arith.constant 0 : i32
    %c0_i32_1 = arith.constant 0 : i32
    return %c0_i32, %c0_i32_0 : i32, i32
  }
  func.func @transform_5(%arg0: i32) -> (i32, i32) {
    %c0_i32 = arith.constant 0 : i32
    %c0_i32_0 = arith.constant 0 : i32
    return %arg0, %c0_i32 : i32, i32
  }
  func.func @transform_6(%arg0: i32) -> (i32, i32) {
    %c0_i32 = arith.constant 0 : i32
    %c0_i32_0 = arith.constant 0 : i32
    return %arg0, %c0_i32 : i32, i32
  }
}

</mosaic_0001>

<bundles_post_ra>
// kernel: a_call__.1
= control target key start
LH: loop header
LB: loop body
LE: loop exit
PB: predicated region body
PF: predicated region fallthrough
CT: control target
= control target key end

     0   :  { %s1858_s21 = smov 0   ;;  %s1860_s22 = smov 0   ;;  %s2166_s0 = inlined_call_operand.vmem [shape: bf16[68,128], index: 0, kind: input, shape index: {}]   ;;  %s2167_s1 = inlined_call_operand.vmem [shape: bf16[128,256], index: 1, kind: input, shape index: {}]   ;;  %s2168_s2 = inlined_call_operand.vmem [shape: f32[1,256], index: 2, kind: input, shape index: {}]   ;;  %s2169_s3 = inlined_call_operand.vmem [shape: bf16[256,256], index: 3, kind: input, shape index: {}]   ;;  %s2170_s4 = inlined_call_operand.vmem [shape: f32[1,256], index: 4, kind: input, shape index: {}]   ;;  %s2171_s5 = inlined_call_operand.vmem [shape: bf16[68,128], index: 5, kind: output, shape index: {0}]   ;;  %s2172_s6 = inlined_call_operand.vmem [shape: bf16[68,128], index: 6, kind: output, shape index: {1}]  }
   0x1   :  { %s1862_s23 = smov 0  }
   0x2 LB: > { %s1871_s24 = sadd.s32 4294967295, %s1756_s23   ;;  %s1873_s25 = sadd.s32 1, %s1756_s23   ;;  %s1756_s23 = sphi %s1862_s23, %s2182_s23   ;;  %s1752_s22 = sphi %s1860_s22, %s2181_s22   ;;  %s1748_s21 = sphi %s1858_s21, %s2180_s21  }
   0x3   : > { %s131_s26 = ssub.s32 %s1756_s23, %s1873_s25  ;;  %s134_s27 = sadd.s32 1, %s1752_s22 }
   0x4   : > { %p132_p0 = scmp.eq.s32.totalorder %s131_s26, 0  ;;  %p144_p1 = scmp.ne.s32.totalorder %s1752_s22, %s1748_s21 }
   0x5   : > { %p145_p2 = scmp.eq.s32.totalorder %s1871_s24, 1  ;;  %p1284_p3 = scmp.ge.s32.totalorder %s1756_s23, 1 }
   0x6   : > { %s1881_s28 = scalar_select %p132_p0, %s1752_s22, %s134_s27  }
   0x7   : > { %p1883_p4 = por %p145_p2, %p144_p1  ;;  %p224_p5 = scmp.lt.s32.totalorder %s1756_s23, 3 }
   0x9   : > { %p225_p6 = pnand %p1284_p3, %p224_p5 }
   0xa   : > { %v1575_v0 = vld [vmem:[%s2167_s1 + $0x4] ss:$8 sps:$4 sm:$0xff] (!%p225_p6)   ;;  %s1891_s8 = smul.u32 (!%p225_p6), 6, %s1871_s24  ;;  %v1577_v1 = vld [vmem:[%s2167_s1] ss:$8 sps:$4 sm:$0xff] (!%p225_p6)   ;;  %v1822_v2 = vmov (!%p225_p6), 0   ;;  %v310_v52 = vlaneseq (!%p225_p6) }
   0xb   : > { %228 = sbr.rel (%p225_p6) target bundleno = 648 (0x288), region = 40  ;;  %450 = vmatprep.mubr.bf16.mxu0 (!%p225_p6), %v1822_v2  ;;  %418 = vmatprep.subr.bf16.mxu0 (!%p225_p6), %v1575_v0  ;;  %v1578_v3 = vld [vmem:[%s2167_s1 + $0x14] ss:$8 sps:$4 sm:$0xff] (!%p225_p6)   ;;  %v1580_v4 = vld [vmem:[%s2167_s1 + $0x10] ss:$8 sps:$4 sm:$0xff] (!%p225_p6)   ;;  %s252_s13 = sand.u32 (!%p225_p6), 1, %s1748_s21  }
   0xc   : > { %p266_p7 = scmp.lt.s32.totalorder (!%p225_p6), %s1891_s8, 8  ;;  %419 = vmatpush1.bf16.msra.mxu0 (!%p225_p6), %v1577_v1  ;;  %v1581_v5 = vld [vmem:[%s2167_s1 + $0x24] ss:$8 sps:$4 sm:$0xff] (!%p225_p6)   ;;  %v1583_v6 = vld [vmem:[%s2167_s1 + $0x20] ss:$8 sps:$4 sm:$0xff] (!%p225_p6)   ;;  %v311_v53 = vshrl.u32 (!%p225_p6), %v310_v52, 7 }
   0xd   : > { %420 = vmatprep.subr.bf16.mxu0 (!%p225_p6), %v1578_v3  ;;  %v1584_v7 = vld [vmem:[%s2167_s1 + $0x34] ss:$8 sps:$4 sm:$0xff] (!%p225_p6)   ;;  %v1586_v8 = vld [vmem:[%s2167_s1 + $0x30] ss:$8 sps:$4 sm:$0xff] (!%p225_p6)   ;;  %v1587_v9 = vld [vmem:[%s2167_s1 + $0x44] ss:$8 sps:$4 sm:$0xff] (!%p225_p6)  }
   0xe   : > { %v1589_v10 = vld [vmem:[%s2167_s1 + $0x40] ss:$8 sps:$4 sm:$0xff] (!%p225_p6)   ;;  %v1602_v11 = vld [vmem:[%s2169_s3 + $0x4] ss:$8 sps:$4 sm:$0xff] (!%p225_p6)   ;;  %v1605_v13 = vld [vmem:[%s2169_s3 + $0x14] ss:$8 sps:$4 sm:$0xff] (!%p225_p6)  }
   0xf   : > { %v1604_v12 = vld [vmem:[%s2169_s3] ss:$8 sps:$4 sm:$0xff] (!%p225_p6)   ;;  %v1590_v14 = vld [vmem:[%s2167_s1 + $0x54] ss:$8 sps:$4 sm:$0xff] (!%p225_p6)   ;;  %697 = vmatprep.subr.bf16.mxu1 (!%p225_p6), %v1602_v11  ;;  %v1607_v15 = vld [vmem:[%s2169_s3 + $0x10] ss:$8 sps:$4 sm:$0xff] (!%p225_p6)  }
  0x10   : > { %421 = vmatpush1.bf16.msra.mxu0 (!%p225_p6), %v1580_v4  ;;  %698 = vmatpush1.bf16.msra.mxu1 (!%p225_p6), %v1604_v12  ;;  %v1608_v16 = vld [vmem:[%s2169_s3 + $0x24] ss:$8 sps:$4 sm:$0xff] (!%p225_p6)   ;;  %v1592_v17 = vld [vmem:[%s2167_s1 + $0x50] ss:$8 sps:$4 sm:$0xff] (!%p225_p6)   ;;  %v1610_v19 = vld [vmem:[%s2169_s3 + $0x20] ss:$8 sps:$4 sm:$0xff] (!%p225_p6)  }
  0x11   : > { %422 = vmatprep.subr.bf16.mxu0 (!%p225_p6), %v1581_v5  ;;  %699 = vmatprep.subr.bf16.mxu1 (!%p225_p6), %v1605_v13  ;;  %v1593_v18 = vld [vmem:[%s2167_s1 + $0x64] ss:$8 sps:$4 sm:$0xff] (!%p225_p6)   ;;  %v1611_v20 = vld [vmem:[%s2169_s3 + $0x34] ss:$8 sps:$4 sm:$0xff] (!%p225_p6)   ;;  %v1595_v21 = vld [vmem:[%s2167_s1 + $0x60] ss:$8 sps:$4 sm:$0xff] (!%p225_p6)  }
  0x12   : > { %s267_s17 = scalar_select %p266_p7, %s1891_s8, 8  ;;  %v1596_v22 = vld [vmem:[%s2167_s1 + $0x74] ss:$8 sps:$4 sm:$0xff]   ;;  %v1613_v23 = vld [vmem:[%s2169_s3 + $0x30] ss:$8 sps:$4 sm:$0xff]   ;;  %v312_v54 = vsub.s32 0, %v311_v53 }
  0x13   : > { %v1614_v24 = vld [vmem:[%s2169_s3 + $0x44] ss:$8 sps:$4 sm:$0xff]   ;;  %v1598_v25 = vld [vmem:[%s2167_s1 + $0x70] ss:$8 sps:$4 sm:$0xff]   ;;  %v1616_v27 = vld [vmem:[%s2169_s3 + $0x40] ss:$8 sps:$4 sm:$0xff]  }
  0x14   : > { %s1285_s18 = sshll.u32 %s267_s17, 2  ;;  %423 = vmatpush1.bf16.msra.mxu0 %v1583_v6  ;;  %700 = vmatpush1.bf16.msra.mxu1 %v1607_v15  ;;  %v1617_v28 = vld [vmem:[%s2169_s3 + $0x54] ss:$8 sps:$4 sm:$0xff]   ;;  %v1619_v29 = vld [vmem:[%s2169_s3 + $0x50] ss:$8 sps:$4 sm:$0xff]   ;;  %v316_v56 = vsub.s32 1, %v311_v53 }
  0x15   : > { %s1917_s7 = scalar_lea.vmem %s2166_s0, %s1285_s18  ;;  %424 = vmatprep.subr.bf16.mxu0 %v1584_v7  ;;  %701 = vmatprep.subr.bf16.mxu1 %v1608_v16  ;;  %v1620_v30 = vld [vmem:[%s2169_s3 + $0x64] ss:$8 sps:$4 sm:$0xff]   ;;  %v1622_v31 = vld [vmem:[%s2169_s3 + $0x60] ss:$8 sps:$4 sm:$0xff]   ;;  %v1623_v33 = vld [vmem:[%s2169_s3 + $0x74] ss:$8 sps:$4 sm:$0xff]  }
  0x16   : > { %v1599_v26 = vld [vmem:[%s1917_s7] sm:$0xff]   ;;  %v1600_v32 = vld [vmem:[%s1917_s7 + $0x8] sm:$0xff]   ;;  %v1625_v34 = vld [vmem:[%s2169_s3 + $0x70] ss:$8 sps:$4 sm:$0xff]   ;;  %s1419_s14 = smul.u32 24, %s252_s13  ;;  %s844_s16 = ssub.s32 (%p1883_p4), 9, %s1891_s8 }
  0x17   : > { %v1626_v35 = vld [vmem:[%s2169_s3 + $0x84] ss:$8 sps:$4 sm:$0xff]   ;;  %v1628_v36 = vld [vmem:[%s2169_s3 + $0x80] ss:$8 sps:$4 sm:$0xff]   ;;  %v1601_v37 = vld [vmem:[%s1917_s7 + $0x10] sm:$0xff]   ;;  %s1383_s17 = smul.u32 (%p1883_p4), 24, %s1871_s24 }
  0x18   : > { %425 = vmatpush1.bf16.msra.mxu0 %v1586_v8  ;;  %702 = vmatpush1.bf16.msra.mxu1 %v1610_v19  ;;  %v1629_v38 = vld [vmem:[%s2169_s3 + $0x94] ss:$8 sps:$4 sm:$0xff]   ;;  %v1631_v39 = vld [vmem:[%s2169_s3 + $0x90] ss:$8 sps:$4 sm:$0xff]   ;;  %v1632_v40 = vld [vmem:[%s2169_s3 + $0xa4] ss:$8 sps:$4 sm:$0xff]  }
  0x19   : > { %426 = vmatprep.subr.bf16.mxu0 %v1587_v9  ;;  %703 = vmatprep.subr.bf16.mxu1 %v1611_v20  ;;  %v1634_v41 = vld [vmem:[%s2169_s3 + $0xa0] ss:$8 sps:$4 sm:$0xff]   ;;  %v1635_v42 = vld [vmem:[%s2169_s3 + $0xb4] ss:$8 sps:$4 sm:$0xff]   ;;  %v1637_v43 = vld [vmem:[%s2169_s3 + $0xb0] ss:$8 sps:$4 sm:$0xff]   ;;  %s2071_s20 = scalar_lea.vmem (%p1883_p4), %s2171_s5, %s1383_s17  }
  0x1a   : > { %v1638_v44 = vld [vmem:[%s2169_s3 + $0xc4] ss:$8 sps:$4 sm:$0xff]   ;;  %v1640_v45 = vld [vmem:[%s2169_s3 + $0xc0] ss:$8 sps:$4 sm:$0xff]   ;;  %v1641_v46 = vld [vmem:[%s2169_s3 + $0xd4] ss:$8 sps:$4 sm:$0xff]  }
  0x1b   : > { %v1643_v47 = vld [vmem:[%s2169_s3 + $0xd0] ss:$8 sps:$4 sm:$0xff]   ;;  %v1644_v48 = vld [vmem:[%s2169_s3 + $0xe4] ss:$8 sps:$4 sm:$0xff]   ;;  %v1646_v49 = vld [vmem:[%s2169_s3 + $0xe0] ss:$8 sps:$4 sm:$0xff]  }
  0x1c   : > { %427 = vmatpush1.bf16.msra.mxu0 %v1589_v10  ;;  %704 = vmatpush1.bf16.msra.mxu1 %v1613_v23  ;;  %v1647_v50 = vld [vmem:[%s2169_s3 + $0xf4] ss:$8 sps:$4 sm:$0xff]   ;;  %v1649_v51 = vld [vmem:[%s2169_s3 + $0xf0] ss:$8 sps:$4 sm:$0xff]   ;;  %v308_v55 = vld [vmem:[%s2168_s2] sm:$0x3] }
  0x1d   : > { %428 = vmatprep.subr.bf16.mxu0 %v1590_v14  ;;  %705 = vmatprep.subr.bf16.mxu1 %v1614_v24  ;;  %v313_v57 = vrot.slane %v308_v55, %v312_v54  ;;  %v317_v59 = vrot.slane %v308_v55, %v316_v56  ;;  %s2054_s15 = scalar_lea.vmem [#allocation2], %s1419_s14   ;;  %s2057_s21 = scalar_lea.vmem [#allocation3], %s1419_s14  }
  0x1e   : > { %p845_p8 = scmp.lt.s32.totalorder (%p1883_p4), %s844_s16, 6 }
  0x20   : > { %429 = vmatpush1.bf16.msra.mxu0 %v1592_v17  ;;  %706 = vmatpush1.bf16.msra.mxu1 %v1616_v27 }
  0x21   : > { %430 = vmatprep.subr.bf16.mxu0 %v1593_v18  ;;  %707 = vmatprep.subr.bf16.mxu1 %v1617_v28 }
  0x24   : > { %431 = vmatpush1.bf16.msra.mxu0 %v1595_v21  ;;  %708 = vmatpush1.bf16.msra.mxu1 %v1619_v29 }
  0x25   : > { %432 = vmatprep.subr.bf16.mxu0 %v1596_v22  ;;  %709 = vmatprep.subr.bf16.mxu1 %v1620_v30 }
  0x28   : > { %433 = vmatpush1.bf16.msra.mxu0 %v1598_v25  ;;  %710 = vmatpush1.bf16.msra.mxu1 %v1622_v31  ;;  %v525_v31 = vld [vmem:[%s2170_s4] sm:$0x3] }
  0x29   : > { %711 = vmatprep.subr.bf16.mxu1 %v1623_v33  ;;  %v534_v33 = vrot.slane %v525_v31, %v316_v56 }
  0x2b   : > { %451 = vmatmul.mubr.bf16.vlgmr.msra.gmra.mrb[0].mxu0 %v1599_v26 }
  0x2c   : > { %460 = vmatprep.mubr.bf16.mxu0 %v1822_v2  ;;  %712 = vmatpush1.bf16.msra.mxu1 %v1625_v34 }
  0x2d   : > { %713 = vmatprep.subr.bf16.mxu1 %v1626_v35 }
  0x30   : > { %714 = vmatpush1.bf16.msra.mxu1 %v1628_v36 }
  0x31   : > { %715 = vmatprep.subr.bf16.mxu1 %v1629_v38 }
  0x33   : > { %461 = vmatmul.mubr.bf16.gmra.mrb[4].mxu0 %v1600_v32  ;;  %v530_v32 = vrot.slane %v525_v31, %v312_v54 }
  0x34   : > { %470 = vmatprep.mubr.bf16.mxu0 %v1822_v2  ;;  %716 = vmatpush1.bf16.msra.mxu1 %v1631_v39 }
  0x35   : > { %717 = vmatprep.subr.bf16.mxu1 %v1632_v40 }
  0x38   : > { %718 = vmatpush1.bf16.msra.mxu1 %v1634_v41 }
  0x39   : > { %719 = vmatprep.subr.bf16.mxu1 %v1635_v42 }
  0x3b   : > { %471 = vmatmul.mubr.bf16.gmra.mrb[8].mxu0 %v1601_v37 }
  0x3c   : > { %720 = vmatpush1.bf16.msra.mxu1 %v1637_v43 }
  0x3d   : > { %721 = vmatprep.subr.bf16.mxu1 %v1638_v44 }
  0x40   : > { %722 = vmatpush1.bf16.msra.mxu1 %v1640_v45 }
  0x41   : > { %723 = vmatprep.subr.bf16.mxu1 %v1641_v46 }
  0x44   : > { %724 = vmatpush1.bf16.msra.mxu1 %v1643_v47 }
  0x45   : > { %725 = vmatprep.subr.bf16.mxu1 %v1644_v48 }
  0x48   : > { %726 = vmatpush1.bf16.msra.mxu1 %v1646_v49 }
  0x49   : > { %727 = vmatprep.subr.bf16.mxu1 %v1647_v50 }
  0x4c   : > { %728 = vmatpush1.bf16.msra.mxu1 %v1649_v51 }
  0xfe   : > { %v452_v58 = vpop.f32.mrb[0].mxu0 }
  0xff   : > { %v454_v60 = vpop.f32.mrb[1].mxu0  ;;  %v453_v62 = vadd.f32 %v452_v58, %v313_v57 }
 0x100   : > { %v456_v61 = vpop.f32.mrb[2].mxu0  ;;  %v455_v1 = vadd.f32 %v454_v60, %v317_v59 }
 0x101   : > { %v457_v63 = vadd.f32 %v456_v61, %v313_v57  ;;  %v458_v0 = vpop.f32.mrb[3].mxu0 }
 0x102   : > { %v459_v2 = vadd.f32 %v458_v0, %v317_v59 }
 0x103   : > { %v481_v3 = vpack.c.bf16 %v457_v63, %v453_v62 }
 0x104   : > { %v482_v4 = vpack.c.bf16 %v459_v2, %v455_v1 }
 0x106   : > { %v462_v5 = vpop.f32.mrb[4].mxu0  ;;  %1650 = vtanh.bf16 %v482_v4 }
 0x107   : > { %1652 = vtanh.bf16 %v481_v3  ;;  %v464_v6 = vpop.f32.mrb[5].mxu0  ;;  %v463_v8 = vadd.f32 %v462_v5, %v313_v57 }
 0x108   : > { %v466_v7 = vpop.f32.mrb[6].mxu0  ;;  %v465_v11 = vadd.f32 %v464_v6, %v317_v59 }
 0x109   : > { %v467_v9 = vadd.f32 %v466_v7, %v313_v57  ;;  %v468_v10 = vpop.f32.mrb[7].mxu0 }
 0x10a   : > { %v469_v12 = vadd.f32 %v468_v10, %v317_v59 }
 0x10b   : > { %v483_v13 = vpack.c.bf16 %v467_v9, %v463_v8 }
 0x10c   : > { %v484_v14 = vpack.c.bf16 %v469_v12, %v465_v11 }
 0x10e   : > { %1654 = vtanh.bf16 %v484_v14  ;;  %v472_v15 = vpop.f32.mrb[8].mxu0 }
 0x10f   : > { %1656 = vtanh.bf16 %v483_v13  ;;  %v474_v16 = vpop.f32.mrb[9].mxu0  ;;  %v473_v19 = vadd.f32 %v472_v15, %v313_v57 }
 0x110   : > { %v476_v17 = vpop.f32.mrb[10].mxu0  ;;  %v475_v23 = vadd.f32 %v474_v16, %v317_v59 }
 0x111   : > { %v1651_v18 = vpop.eup %1650  ;;  %v477_v20 = vadd.f32 %v476_v17, %v313_v57  ;;  %v478_v21 = vpop.f32.mrb[11].mxu0 }
 0x112   : > { %v1653_v22 = vpop.eup %1652  ;;  %v479_v24 = vadd.f32 %v478_v21, %v317_v59  ;;  %729 = vmatprep.mubr.bf16.mxu1 %v1651_v18 }
 0x113   : > { %v485_v25 = vpack.c.bf16 %v477_v20, %v473_v19  ;;  %730 = vmatmul.mubr.bf16.vlgmr.msra.gmra.mrb[0].mxu1 %v1653_v22 }
 0x114   : > { %v486_v26 = vpack.c.bf16 %v479_v24, %v475_v23 }
 0x116   : > { %1658 = vtanh.bf16 %v486_v26 }
 0x117   : > { %1660 = vtanh.bf16 %v485_v25 }
 0x119   : > { %v1655_v27 = vpop.eup %1654 }
 0x11a   : > { %v1657_v28 = vpop.eup %1656  ;;  %739 = vmatprep.mubr.bf16.mxu1 %v1655_v27 }
 0x11b   : > { %740 = vmatmul.mubr.bf16.gmra.mrb[4].mxu1 %v1657_v28 }
 0x121   : > { %v1659_v29 = vpop.eup %1658 }
 0x122   : > { %v1661_v30 = vpop.eup %1660  ;;  %749 = vmatprep.mubr.bf16.mxu1 %v1659_v29 }
 0x123   : > { %750 = vmatmul.mubr.bf16.gmra.mrb[8].mxu1 %v1661_v30 }
 0x1e6   : > { %v731_v34 = vpop.f32.mrb[0].mxu1 }
 0x1e7   : > { %v732_v35 = vadd.f32 %v731_v34, %v530_v32  ;;  %v733_v36 = vpop.f32.mrb[1].mxu1 }
 0x1e8   : > { %v734_v37 = vadd.f32 %v733_v36, %v534_v33  ;;  %v735_v38 = vpop.f32.mrb[2].mxu1 }
 0x1e9   : > { %v736_v39 = vadd.f32 %v735_v38, %v530_v32  ;;  %v737_v40 = vpop.f32.mrb[3].mxu1  ;;  %v760_v42 = vmax.f32 %v732_v35, 0.0 }
 0x1ea   : > { %v738_v41 = vadd.f32 %v737_v40, %v534_v33  ;;  %v761_v44 = vmax.f32 %v734_v37, 0.0 }
 0x1eb   : > { %v762_v43 = vmax.f32 %v736_v39, 0.0 }
 0x1ec   : > { %v763_v45 = vmax.f32 %v738_v41, 0.0 }
 0x1ed   : > { %v1388_v46 = vpack.c.bf16 %v762_v43, %v760_v42 }
 0x1ee   : > { %v1403_v47 = vpack.c.bf16 %v763_v45, %v761_v44  ;;  %v741_v48 = vpop.f32.mrb[4].mxu1 }
 0x1ef   : > { %1389 = vst [vmem:[%s2054_s15] sm:$0xff] %v1388_v46   ;;  %v742_v49 = vadd.f32 %v741_v48, %v530_v32  ;;  %v743_v50 = vpop.f32.mrb[5].mxu1 }
 0x1f0   : > { %1404 = vst [vmem:[%s2057_s21] sm:$0xff] %v1403_v47   ;;  %v744_v51 = vadd.f32 %v743_v50, %v534_v33  ;;  %v745_v52 = vpop.f32.mrb[6].mxu1 }
 0x1f1   : > { %v746_v53 = vadd.f32 %v745_v52, %v530_v32  ;;  %v747_v54 = vpop.f32.mrb[7].mxu1  ;;  %v764_v56 = vmax.f32 %v742_v49, 0.0 }
 0x1f2   : > { %v748_v55 = vadd.f32 %v747_v54, %v534_v33  ;;  %v765_v58 = vmax.f32 %v744_v51, 0.0 }
 0x1f3   : > { %v766_v57 = vmax.f32 %v746_v53, 0.0 }
 0x1f4   : > { %v767_v59 = vmax.f32 %v748_v55, 0.0 }
 0x1f5   : > { %v1393_v60 = vpack.c.bf16 %v766_v57, %v764_v56 }
 0x1f6   : > { %v1408_v61 = vpack.c.bf16 %v767_v59, %v765_v58  ;;  %v751_v62 = vpop.f32.mrb[8].mxu1 }
 0x1f7   : > { %1415 = vst [vmem:[%s2054_s15 + $0x8] sm:$0xff] %v1393_v60   ;;  %v752_v63 = vadd.f32 %v751_v62, %v530_v32  ;;  %v753_v0 = vpop.f32.mrb[9].mxu1 }
 0x1f8   : > { %1417 = vst [vmem:[%s2057_s21 + $0x8] sm:$0xff] %v1408_v61   ;;  %v754_v1 = vadd.f32 %v753_v0, %v534_v33  ;;  %v755_v2 = vpop.f32.mrb[10].mxu1 }
 0x1f9   : > { %v756_v3 = vadd.f32 %v755_v2, %v530_v32  ;;  %v757_v4 = vpop.f32.mrb[11].mxu1  ;;  %v768_v6 = vmax.f32 %v752_v63, 0.0 }
 0x1fa   : > { %v758_v5 = vadd.f32 %v757_v4, %v534_v33  ;;  %v769_v8 = vmax.f32 %v754_v1, 0.0  ;;  %842 = sbr.rel (!%p1883_p4) target bundleno = 577 (0x241), region = 44 }
 0x1fb   : > { %v770_v7 = vmax.f32 %v756_v3, 0.0 }
 0x1fc   : > { %v771_v9 = vmax.f32 %v758_v5, 0.0 }
 0x1fd   : > { %v1398_v10 = vpack.c.bf16 %v770_v7, %v768_v6 }
 0x1fe   : > { %v1413_v11 = vpack.c.bf16 %v771_v9, %v769_v8 }
 0x1ff   : > { %1416 = vst [vmem:[%s2054_s15 + $0x10] sm:$0xff] %v1398_v10  }
 0x200   : > { %1418 = vst [vmem:[%s2057_s21 + $0x10] sm:$0xff] %v1413_v11  }
 0x201   : > { %s2184_s16 = smov (!%p845_p8, %s844_s16), 6 }
 0x202   : > { %s1349_s23 = sshll.u32 %s2184_s16, 6 }
 0x203   : > { %p1352_p9 = scmp.eq.s32.totalorder %s1349_s23, 0 }
 0x204   : > { %1662 = sdivrem.u32 (!%p1352_p9), %s2184_s16, 6 }
 0x205   : > { %853 = sbr.rel (%p1352_p9) target bundleno = 577 (0x241), region = 48 }
 0x20d   : > { %s2077_s26 = spop.drf %1662 }
 0x20e   : > { %p1353_p10 = scmp.le.s32.totalorder %s2077_s26, 0 }
 0x20f   : > { %s2174_s7 = smov (!%p1353_p10), %s2071_s20  ;;  %s2175_s27 = smov (!%p1353_p10), %s2054_s15 }
 0x210   : > { %1200 = sbr.rel (%p1353_p10) target bundleno = 548 (0x224), region = 188  ;;  %s2086_s30 = smov (!%p1353_p10), 0  }
 0x211   : > { %s2088_s9 = smov (!%p1353_p10), 0  }
 0x217 LB: >> { %v870_v12 = vld [vmem:[%s1764_s27] sm:$0xf]  ;;  %v872_v13 = vld [vmem:[%s1764_s27 + $0x4] sm:$0xf]  ;;  %v874_v14 = vld [vmem:[%s1764_s27 + $0x8] sm:$0xf]  ;;  %s1772_s9 = sphi %s2088_s9, %s864_s9   ;;  %s1768_s30 = sphi %s2086_s30, %s2176_s30   ;;  %s1764_s27 = sphi %s2175_s27, %s887_s27   ;;  %s1760_s7 = sphi %s2174_s7, %s888_s7  }
 0x218   : >> { %871 = vst [vmem:[%s1760_s7] sm:$0xf] %v870_v12  ;;  %873 = vst [vmem:[%s1760_s7 + $0x4] sm:$0xf] %v872_v13  ;;  %v876_v15 = vld [vmem:[%s1764_s27 + $0xc] sm:$0xf]  ;;  %s882_s10 = sadd.s32 1, %s1768_s30 }
 0x219   : >> { %875 = vst [vmem:[%s1760_s7 + $0x8] sm:$0xf] %v874_v14  ;;  %v878_v16 = vld [vmem:[%s1764_s27 + $0x10] sm:$0xf]  ;;  %v880_v17 = vld [vmem:[%s1764_s27 + $0x14] sm:$0xf]  ;;  %p883_p11 = scmp.ge.s32.totalorder %s882_s10, %s2077_s26 }
 0x21a   : >> { %877 = vst [vmem:[%s1760_s7 + $0xc] sm:$0xf] %v876_v15  ;;  %879 = vst [vmem:[%s1760_s7 + $0x10] sm:$0xf] %v878_v16  ;;  %s864_s9 = sadd.s32 1, %s1772_s9  }
 0x21b   : >> { %881 = vst [vmem:[%s1760_s7 + $0x14] sm:$0xf] %v880_v17  ;;  %s2186_s10 = smov (%p883_p11, %s882_s10), 0  ;;  %p863_p12 = scmp.ge.s32.totalorder %s864_s9, %s2077_s26 }
 0x21c   : >> { %s885_s11 = smul.u32 24, %s2186_s10  ;;  %s2176_s30 = smov %s2186_s10 }
 0x21d   : > { %866 = sbr.rel (!%p863_p12) target bundleno = 535 (0x217), region = 194 }
 0x21e   : >> { %s887_s27 = scalar_lea.vmem %s2054_s15, %s885_s11 [#allocation2]   ;;  %s888_s7 = scalar_lea.vmem %s2071_s20, %s885_s11  }
 0x224 PF: > { %1664 = sdivrem.u32 %s2184_s16, 6 }
 0x225   : > { %s1354_s12 = smul.u32 24, %s2077_s26 }
 0x227   : > { %s893_s13 = scalar_lea.vmem %s2054_s15, %s1354_s12 [#allocation2]   ;;  %s895_s14 = scalar_lea.vmem %s2071_s20, %s1354_s12  }
 0x22d   : > { %s1665_s17 = spop.drf %1664 }
 0x22e   : > { %p1356_p13 = scmp.le.s32.totalorder %s1665_s17, 0 }
 0x22f   : > { %s1774_s18 = smov (!%p1356_p13), %s895_s14   ;;  %s1778_s19 = smov (!%p1356_p13), %s893_s13  }
 0x230   : > { %1214 = sbr.rel (%p1356_p13) target bundleno = 577 (0x241), region = 199  ;;  %s1782_s23 = smov (!%p1356_p13), 0  }
 0x231   : > { %s1786_s11 = smov (!%p1356_p13), 0  }
 0x237 LB: >> { %v905_v18 = vld [vmem:[%s1780_s19] sm:$0xf]  ;;  %s907_s7 = sadd.s32 1, %s1784_s23  ;;  %s899_s11 = sadd.s32 1, %s1788_s11   ;;  %s1788_s11 = sphi %s1786_s11, %s899_s11   ;;  %s1784_s23 = sphi %s1782_s23, %s1783_s23   ;;  %s1780_s19 = sphi %s1778_s19, %s912_s19   ;;  %s1776_s18 = sphi %s1774_s18, %s913_s18  }
 0x238   : >> { %906 = vst [vmem:[%s1776_s18] sm:$0xf] %v905_v18  ;;  %p908_p0 = scmp.ge.s32.totalorder %s907_s7, %s1665_s17  ;;  %p898_p1 = scmp.ge.s32.totalorder %s899_s11, %s1665_s17 }
 0x23a   : >> { %s2188_s7 = smov (%p908_p0, %s907_s7), 0  ;;  %901 = sbr.rel (!%p898_p1) target bundleno = 567 (0x237), region = 205 }
 0x23b   : >> { %s1357_s15 = sshll.u32 %s2188_s7, 2  ;;  %s1783_s23 = smov %s2188_s7  }
 0x23c   : >> { %s912_s19 = scalar_lea.vmem %s893_s13, %s1357_s15 [#allocation2]   ;;  %s913_s18 = scalar_lea.vmem %s895_s14, %s1357_s15  }
 0x241 PF: > { %975 = sbr.rel (!%p1883_p4) target bundleno = 648 (0x288), region = 92  ;;  %s977_s16 = ssub.s32 (%p1883_p4), 9, %s1891_s8 }
 0x242   : > { %s1384_s20 = smul.u32 (%p1883_p4), 24, %s1871_s24  ;;  %p978_p2 = scmp.lt.s32.totalorder (%p1883_p4), %s977_s16, 6 }
 0x244   : > { %s2117_s30 = scalar_lea.vmem (%p1883_p4), %s2172_s6, %s1384_s20  }
 0x248   : > { %s2190_s16 = smov (!%p978_p2, %s977_s16), 6 }
 0x249   : > { %s1359_s9 = sshll.u32 %s2190_s16, 6 }
 0x24a   : > { %p1362_p3 = scmp.eq.s32.totalorder %s1359_s9, 0 }
 0x24b   : > { %1666 = sdivrem.u32 (!%p1362_p3), %s2190_s16, 6 }
 0x24c   : > { %986 = sbr.rel (%p1362_p3) target bundleno = 648 (0x288), region = 96 }
 0x254   : > { %s2123_s29 = spop.drf %1666 }
 0x255   : > { %p1363_p4 = scmp.le.s32.totalorder %s2123_s29, 0 }
 0x256   : > { %s2177_s24 = smov (!%p1363_p4), %s2117_s30  ;;  %s2178_s8 = smov (!%p1363_p4), %s2057_s21 }
 0x257   : > { %1228 = sbr.rel (%p1363_p4) target bundleno = 619 (0x26b), region = 210  ;;  %s2132_s10 = smov (!%p1363_p4), 0  }
 0x258   : > { %s2134_s12 = smov (!%p1363_p4), 0  }
 0x25e LB: >> { %v1003_v19 = vld [vmem:[%s1796_s8] sm:$0xf]  ;;  %v1005_v20 = vld [vmem:[%s1796_s8 + $0x4] sm:$0xf]  ;;  %v1007_v21 = vld [vmem:[%s1796_s8 + $0x8] sm:$0xf]  ;;  %s1804_s12 = sphi %s2134_s12, %s997_s12   ;;  %s1800_s10 = sphi %s2132_s10, %s2179_s10   ;;  %s1796_s8 = sphi %s2178_s8, %s1020_s8   ;;  %s1792_s24 = sphi %s2177_s24, %s1021_s24  }
 0x25f   : >> { %1004 = vst [vmem:[%s1792_s24] sm:$0xf] %v1003_v19  ;;  %1006 = vst [vmem:[%s1792_s24 + $0x4] sm:$0xf] %v1005_v20  ;;  %v1009_v22 = vld [vmem:[%s1796_s8 + $0xc] sm:$0xf]  ;;  %s1015_s13 = sadd.s32 1, %s1800_s10 }
 0x260   : >> { %1008 = vst [vmem:[%s1792_s24 + $0x8] sm:$0xf] %v1007_v21  ;;  %v1011_v23 = vld [vmem:[%s1796_s8 + $0x10] sm:$0xf]  ;;  %v1013_v24 = vld [vmem:[%s1796_s8 + $0x14] sm:$0xf]  ;;  %p1016_p5 = scmp.ge.s32.totalorder %s1015_s13, %s2123_s29 }
 0x261   : >> { %1010 = vst [vmem:[%s1792_s24 + $0xc] sm:$0xf] %v1009_v22  ;;  %1012 = vst [vmem:[%s1792_s24 + $0x10] sm:$0xf] %v1011_v23  ;;  %s997_s12 = sadd.s32 1, %s1804_s12  }
 0x262   : >> { %1014 = vst [vmem:[%s1792_s24 + $0x14] sm:$0xf] %v1013_v24  ;;  %s2192_s13 = smov (%p1016_p5, %s1015_s13), 0  ;;  %p996_p6 = scmp.ge.s32.totalorder %s997_s12, %s2123_s29 }
 0x263   : >> { %s1018_s14 = smul.u32 24, %s2192_s13  ;;  %s2179_s10 = smov %s2192_s13 }
 0x264   : > { %999 = sbr.rel (!%p996_p6) target bundleno = 606 (0x25e), region = 216 }
 0x265   : >> { %s1020_s8 = scalar_lea.vmem %s2057_s21, %s1018_s14 [#allocation3]   ;;  %s1021_s24 = scalar_lea.vmem %s2117_s30, %s1018_s14  }
 0x26b PF: > { %1668 = sdivrem.u32 %s2190_s16, 6 }
 0x26c   : > { %s1364_s17 = smul.u32 24, %s2123_s29 }
 0x26e   : > { %s1026_s18 = scalar_lea.vmem %s2057_s21, %s1364_s17 [#allocation3]   ;;  %s1028_s19 = scalar_lea.vmem %s2117_s30, %s1364_s17  }
 0x274   : > { %s1669_s23 = spop.drf %1668 }
 0x275   : > { %p1366_p7 = scmp.le.s32.totalorder %s1669_s23, 0 }
 0x276   : > { %s1806_s11 = smov (!%p1366_p7), %s1028_s19   ;;  %s1810_s7 = smov (!%p1366_p7), %s1026_s18  }
 0x277   : > { %1242 = sbr.rel (%p1366_p7) target bundleno = 648 (0x288), region = 221  ;;  %s1814_s15 = smov (!%p1366_p7), 0  }
 0x278   : > { %s1818_s20 = smov (!%p1366_p7), 0  }
 0x27e LB: >> { %v1038_v25 = vld [vmem:[%s1812_s7] sm:$0xf]  ;;  %s1040_s26 = sadd.s32 1, %s1816_s15  ;;  %s1032_s20 = sadd.s32 1, %s1820_s20   ;;  %s1820_s20 = sphi %s1818_s20, %s1032_s20   ;;  %s1816_s15 = sphi %s1814_s15, %s1815_s15   ;;  %s1812_s7 = sphi %s1810_s7, %s1045_s7   ;;  %s1808_s11 = sphi %s1806_s11, %s1046_s11  }
 0x27f   : >> { %1039 = vst [vmem:[%s1808_s11] sm:$0xf] %v1038_v25  ;;  %p1041_p8 = scmp.ge.s32.totalorder %s1040_s26, %s1669_s23  ;;  %p1031_p9 = scmp.ge.s32.totalorder %s1032_s20, %s1669_s23 }
 0x281   : >> { %s2194_s26 = smov (%p1041_p8, %s1040_s26), 0  ;;  %1034 = sbr.rel (!%p1031_p9) target bundleno = 638 (0x27e), region = 227 }
 0x282   : >> { %s1367_s21 = sshll.u32 %s2194_s26, 2  ;;  %s1815_s15 = smov %s2194_s26  }
 0x283   : >> { %s1045_s7 = scalar_lea.vmem %s1026_s18, %s1367_s21 [#allocation3]   ;;  %s1046_s11 = scalar_lea.vmem %s1028_s19, %s1367_s21  }
 0x288 PF: > { %p14_p10 = scmp.ge.s32.totalorder %s1873_s25, 4   ;;  %s2180_s21 = smov %s1752_s22 }
 0x289   : > { %s2181_s22 = smov %s1881_s28  ;;  %s2182_s23 = smov %s1873_s25 }
 0x28a   :  { %16 = sbr.rel (!%p14_p10) target bundleno = 2 (0x2), region = 238 }

</bundles_post_ra>
